<compile_context>
chip_gen: v5e
topology: v5e:2x2
jax: 0.10.0
libtpu: 0.0.40
codegen_flags: <defaults>
</compile_context>

<pallas_src>
import functools

import jax
import jax.numpy as jnp
from jax.experimental import pallas as pl
from jax.experimental.pallas import tpu as pltpu


def _variable_attention_kernel(x_ref, wqkv_ref, bqkv_ref, ws_ref, hsum_ref,
                               hexp_ref, wo_ref, bo_ref, out_ref,
                               *, n_heads, d_keys, n_vars, b_tile):
    """One grid step handles `b_tile` batch elements entirely in VMEM."""
    H, E, N, BT = n_heads, d_keys, n_vars, b_tile
    HE = H * E

    x = x_ref[...]                                               # (BT*N, D) bf16

    # ---- fused Q/K/V projection: one bf16 MXU matmul, f32 accumulation -----
    qkv = (jnp.dot(x, wqkv_ref[...], preferred_element_type=jnp.float32)
           + bqkv_ref[...])                                      # (BT*N, 3HE) f32
    q = qkv[:, :HE]
    k = qkv[:, HE:2 * HE]
    v = qkv[:, 2 * HE:]

    # ---- summary projection, fused algebraically ----------------------------
    #   logits[b,n,h] = sum_m (scale * <q_bnh, k_bmh>) * ws[m]   (+ bs)
    #                 = <q_bnh, sum_m (scale*ws[m]) * k_bmh>     (+ bs)
    # The (N, N) scores are never materialized; scale is pre-folded into ws;
    # bs is constant along the softmax axis (dim=-2) and cancels exactly.
    ws_col = ws_ref[...].reshape(1, N, 1)                        # f32
    kw = jnp.sum(k.reshape(BT, N, HE) * ws_col, axis=1)          # (BT, HE)
    # TODO(synk): if a bundle dump shows XLU/VPU binding, convert this sublane
    # segment-sum (and `heads` below) into MXU matmuls against a (BT, BT*N)
    # block-diagonal pooling matrix (MXU has slack here).

    # Implicit 3-D broadcast: no materialized broadcast_to copy.
    qkw = (q.reshape(BT, N, HE) * kw[:, None, :]).reshape(BT * N, HE)

    # Per-head inner products for all heads at once via the block-diagonal
    # ones mask (HE, H).  Kept f32: it is a near-empty MXU pass (N == H) and
    # f32 keeps the softmax logits tight.
    logits = jnp.dot(qkw, hsum_ref[...],
                     preferred_element_type=jnp.float32)         # (BT*N, H)

    # ---- softmax over the variable axis n (per batch element, per head) ----
    # NOTE: only H of 128 lanes are active here; fine for small N*H.  For large
    # N*H compute logits transposed so N sits on lanes before the softmax.
    logits3 = logits.reshape(BT, N, H)
    mmax = jnp.max(logits3, axis=1, keepdims=True)
    e = jnp.exp(logits3 - mmax)
    denom = jnp.sum(e, axis=1, keepdims=True)
    beta = e * pl.reciprocal(denom, approx=True)                 # (BT, N, H)

    # ---- weighted sum of V over n, all heads at once -------------------------
    beta_exp = jnp.dot(beta.reshape(BT * N, H), hexp_ref[...],
                       preferred_element_type=jnp.float32)       # (BT*N, HE)
    heads = jnp.sum((beta_exp * v).reshape(BT, N, HE), axis=1)   # (BT, HE)

    # ---- output projection (bf16 operands, f32 accumulation) ----------------
    res = (jnp.dot(heads.astype(wo_ref.dtype), wo_ref[...],
                   preferred_element_type=jnp.float32)
           + bo_ref[...])                                        # (BT, D)
    out_ref[...] = res[None, :, :].astype(out_ref.dtype)         # (1, BT, D) slab


def _vmem_bytes_estimate(bt, N, D, H, E):
    """Rough VMEM footprint of one grid step (blocks + f32 intermediates)."""
    HE = H * E
    rows = bt * N
    io = 2 * rows * D * 2 + 2 * bt * D * 4                 # x (bf16, 2 bufs) + out
    weights = (D * 3 * HE + HE * D) * 2 \
        + (3 * HE + D + N + 2 * H * HE) * 4                # bf16 matmul weights + smalls
    interm = rows * 3 * HE * 4 * 4                         # qkv / qkw / beta_exp etc.
    return io + weights + interm


def _pick_b_tile(B, N, D, H, E, *, target_rows=512, vmem_budget=24 * 2**20):
    """Largest divisor of B giving <= target_rows of BT*N in the fused matmul M
    dim, inside the VMEM budget, sublane-aligned, and (when possible) leaving
    >= 2 grid steps so both v7x TensorCores get work."""
    def aligned(bt):
        return (bt * N) % 8 == 0 or bt * N == B * N
    divisors = [d for d in range(1, B + 1) if B % d == 0 and aligned(d)]
    if not divisors:
        return B
    cands = [d for d in divisors if B // d >= 2] or divisors
    best = cands[0]
    for d in cands:
        if d * N <= target_rows and _vmem_bytes_estimate(d, N, D, H, E) <= vmem_budget:
            best = max(best, d)
    return best


def variable_attention(x, params, *, n_heads, d_keys, b_tile=None):
    B, N, D = x.shape
    H, E = n_heads, d_keys
    HE = H * E
    assert d_keys == D, ("out_projection_layer is Linear(D*n_heads, D) while the "
                         "head concat is d_keys*n_heads -> only consistent for "
                         "d_keys == D")

    if b_tile is None:
        b_tile = _pick_b_tile(B, N, D, H, E)
    assert B % b_tile == 0
    assert (b_tile * N) % 8 == 0 or b_tile * N == B * N, "x block not sublane-aligned"
    grid_len = B // b_tile

    # ---- host-side parameter preprocessing (cheap, once per call) ----------
    scale = 1.0 / (float(E) ** 0.5)
    wqkv = jnp.concatenate([params["wq"], params["wk"], params["wv"]],
                           axis=1).astype(jnp.bfloat16)            # (D, 3HE)
    bqkv = jnp.concatenate([params["bq"], params["bk"], params["bv"]],
                           axis=1).astype(jnp.float32)             # (1, 3HE)
    ws_scaled = (scale * params["ws"]).astype(jnp.float32)         # (N, 1)
    # params["bs"] intentionally unused: constant along the softmax axis -> no-op.
    head_ids = jnp.arange(HE, dtype=jnp.int32) // E
    hsum = (head_ids[:, None] == jnp.arange(H, dtype=jnp.int32)[None, :]
            ).astype(jnp.float32)                                  # (HE, H)
    hexp = hsum.T                                                  # (H, HE)
    wo = params["wo"].astype(jnp.bfloat16)                         # (HE, D)
    bo = params["bo"].astype(jnp.float32)                          # (1, D)
    x2 = x.reshape(B * N, D).astype(jnp.bfloat16)                  # fold batch in host

    vmem_limit = int(min(max(2 * _vmem_bytes_estimate(b_tile, N, D, H, E),
                             32 * 2**20), 64 * 2**20))

    kernel = functools.partial(_variable_attention_kernel,
                               n_heads=H, d_keys=E, n_vars=N, b_tile=b_tile)

    def build(single_buffer_weights):
        const_kwargs = ({"pipeline_mode": pl.Buffered(1)}
                        if single_buffer_weights else {})

        def const(shape):
            return pl.BlockSpec(shape, lambda b: (0,) * len(shape), **const_kwargs)

        return pl.pallas_call(
            kernel,
            out_shape=jax.ShapeDtypeStruct((grid_len, b_tile, D), jnp.float32),
            grid=(grid_len,),
            in_specs=[
                pl.BlockSpec((b_tile * N, D), lambda b: (b, 0)),   # x tile (bf16)
                const((D, 3 * HE)),                                # fused wqkv (bf16)
                const((1, 3 * HE)),                                # fused bqkv
                const((N, 1)),                                     # scale * ws
                const((HE, H)),                                    # head-sum mask
                const((H, HE)),                                    # head-expand mask
                const((HE, D)),                                    # wo (bf16)
                const((1, D)),                                     # bo
            ],
            # (1, bt, D) block == the array's trailing dims -> always legal; for
            # production D >= 128 the store is already lane-dense.
            out_specs=pl.BlockSpec((1, b_tile, D), lambda b: (b, 0, 0)),
            compiler_params=pltpu.CompilerParams(
                dimension_semantics=("parallel",),
                vmem_limit_bytes=vmem_limit),
        )

    args = (x2, wqkv, bqkv, ws_scaled, hsum, hexp, wo, bo)
    try:
        # Single-buffer the constant weight blocks (halves their VMEM reservation;
        # matters on v7x's 64 MiB VMEM).
        out3 = build(single_buffer_weights=True)(*args)
    except Exception:  # pragma: no cover - jax without BlockSpec pipeline_mode
        out3 = build(single_buffer_weights=False)(*args)
    return out3.reshape(B, D)


def _reference(x, p, n_heads, d_keys):
    """Pure-JAX replica of the PyTorch forward (eval mode, dropout = identity)."""
    B, N, D = x.shape
    H, E = n_heads, d_keys
    q = (x @ p["wq"] + p["bq"]).reshape(B, N, H, E)
    k = (x @ p["wk"] + p["bk"]).reshape(B, N, H, E)
    v = (x @ p["wv"] + p["bv"]).reshape(B, N, H, E)
    scale = 1.0 / jnp.sqrt(jnp.float32(E))
    scores = jnp.einsum("bnhd,bmhd->bhnm", q, k)
    logits = (scale * scores) @ p["ws"] + p["bs"][0, 0]        # (B, H, N, 1)
    beta = jax.nn.softmax(logits, axis=-2)
    beta_cal = beta[..., 0].transpose(0, 2, 1)                 # (B, N, H)
    out = jnp.einsum("bnhk,bnh->bhk", v, beta_cal)             # (B, H, E)
    return out.reshape(B, H * E) @ p["wo"] + p["bo"][0]


def _init_params(key, D, N, n_heads, d_keys):
    """Deterministic init mimicking nn.Linear's U(-1/sqrt(fan_in), 1/sqrt(fan_in))."""
    HE = n_heads * d_keys
    ks = jax.random.split(key, 11)
    u = lambda k, shape, fan_in: jax.random.uniform(
        k, shape, jnp.float32, -1.0 / (fan_in ** 0.5), 1.0 / (fan_in ** 0.5))
    return {
        "wq": u(ks[0], (D, HE), D),  "bq": u(ks[1], (1, HE), D),
        "wk": u(ks[2], (D, HE), D),  "bk": u(ks[3], (1, HE), D),
        "wv": u(ks[4], (D, HE), D),  "bv": u(ks[5], (1, HE), D),
        "ws": u(ks[6], (N, 1), N),   "bs": u(ks[7], (1, 1), N),
        "wo": u(ks[8], (HE, D), HE), "bo": u(ks[9], (1, D), HE),
    }


if __name__ == "__main__":
    B, N, D = 4, 8, 32
    n_heads = 2
    d_keys = D   # d_keys must equal D for the module's out projection to be consistent

    key = jax.random.PRNGKey(0)
    k_x, k_p = jax.random.split(key)
    x = jax.random.normal(k_x, (B, N, D), dtype=jnp.float32)
    params = _init_params(k_p, D, N, n_heads, d_keys)

    out = variable_attention(x, params, n_heads=n_heads, d_keys=d_keys)
    out = jax.block_until_ready(out)

    ref = _reference(x, params, n_heads, d_keys)
    assert out.shape == (B, D)
    # Tolerance covers bf16 matmul operands (f32 accumulation), the approximate
    # EUP reciprocal in the softmax, and the algebraic reassociation of the
    # summary projection.
    assert jnp.allclose(out, ref, atol=2e-2, rtol=2e-2), "mismatch vs reference"

    # TODO(synk): attention/output dropout are eval-mode identities (no RNG path).
    print("KERNEL_OK")
</pallas_src>

<mosaic_0001>
module attributes {stable_mosaic.version = 11 : i64} {
  func.func @_variable_attention_kernel(%arg0: i32, %arg1: memref<16x32xbf16, #tpu.memory_space<vmem>>, %arg2: memref<32x192xbf16, #tpu.memory_space<vmem>>, %arg3: memref<1x192xf32, #tpu.memory_space<vmem>>, %arg4: memref<8x1xf32, #tpu.memory_space<vmem>>, %arg5: memref<64x2xf32, #tpu.memory_space<vmem>>, %arg6: memref<2x64xf32, #tpu.memory_space<vmem>>, %arg7: memref<64x32xbf16, #tpu.memory_space<vmem>>, %arg8: memref<1x32xf32, #tpu.memory_space<vmem>>, %arg9: memref<1x2x32xf32, #tpu.memory_space<vmem>>) attributes {dimension_semantics = [#tpu.dimension_semantics<parallel>], iteration_bounds = array<i64: 2>, scalar_prefetch = 0 : i64, scratch_operands = 0 : i64, tpu.core_type = #tpu.core_type<tc>, window_params = [{transform_indices = @transform_0, window_bounds = array<i64: 16, 32>}, {pipeline_mode = #tpu.pipeline_mode<synchronous>, transform_indices = @transform_1, window_bounds = array<i64: 32, 192>}, {pipeline_mode = #tpu.pipeline_mode<synchronous>, transform_indices = @transform_2, window_bounds = array<i64: 1, 192>}, {pipeline_mode = #tpu.pipeline_mode<synchronous>, transform_indices = @transform_3, window_bounds = array<i64: 8, 1>}, {pipeline_mode = #tpu.pipeline_mode<synchronous>, transform_indices = @transform_4, window_bounds = array<i64: 64, 2>}, {pipeline_mode = #tpu.pipeline_mode<synchronous>, transform_indices = @transform_5, window_bounds = array<i64: 2, 64>}, {pipeline_mode = #tpu.pipeline_mode<synchronous>, transform_indices = @transform_6, window_bounds = array<i64: 64, 32>}, {pipeline_mode = #tpu.pipeline_mode<synchronous>, transform_indices = @transform_7, window_bounds = array<i64: 1, 32>}, {transform_indices = @transform_8, window_bounds = array<i64: 1, 2, 32>}]} {
    %c0 = arith.constant 0 : index
    %c0_0 = arith.constant 0 : index
    %0 = vector.load %arg1[%c0, %c0_0] : memref<16x32xbf16, #tpu.memory_space<vmem>>, vector<16x32xbf16>
    %c0_1 = arith.constant 0 : index
    %c0_2 = arith.constant 0 : index
    %1 = vector.load %arg2[%c0_1, %c0_2] : memref<32x192xbf16, #tpu.memory_space<vmem>>, vector<32x192xbf16>
    %cst = arith.constant dense<0.000000e+00> : vector<16x192xf32>
    %2 = tpu.matmul %0, %1, %cst {dimension_numbers = #tpu.dot_dimension_numbers<[1], [0], [0], [1], [0, 0, 1, 1], [], []>} : vector<16x32xbf16>, vector<32x192xbf16>, vector<16x192xf32> -> vector<16x192xf32>
    %c0_3 = arith.constant 0 : index
    %c0_4 = arith.constant 0 : index
    %3 = vector.load %arg3[%c0_3, %c0_4] : memref<1x192xf32, #tpu.memory_space<vmem>>, vector<1x192xf32>
    %4 = vector.broadcast %3 : vector<1x192xf32> to vector<16x192xf32>
    %5 = arith.addf %2, %4 : vector<16x192xf32>
    %6 = vector.extract_strided_slice %5 {offsets = [0, 0], sizes = [16, 64], strides = [1, 1]} : vector<16x192xf32> to vector<16x64xf32>
    %7 = vector.extract_strided_slice %5 {offsets = [0, 64], sizes = [16, 64], strides = [1, 1]} : vector<16x192xf32> to vector<16x64xf32>
    %8 = vector.extract_strided_slice %5 {offsets = [0, 128], sizes = [16, 64], strides = [1, 1]} : vector<16x192xf32> to vector<16x64xf32>
    %c0_5 = arith.constant 0 : index
    %c0_6 = arith.constant 0 : index
    %9 = vector.load %arg4[%c0_5, %c0_6] : memref<8x1xf32, #tpu.memory_space<vmem>>, vector<8x1xf32>
    %10 = vector.shape_cast %9 : vector<8x1xf32> to vector<1x8x1xf32>
    %11 = vector.shape_cast %7 : vector<16x64xf32> to vector<2x8x64xf32>
    %12 = vector.broadcast %10 : vector<1x8x1xf32> to vector<2x8x64xf32>
    %13 = arith.mulf %11, %12 : vector<2x8x64xf32>
    %cst_7 = arith.constant dense<0.000000e+00> : vector<2x64xf32>
    %14 = vector.multi_reduction <add>, %13, %cst_7 [1] : vector<2x8x64xf32> to vector<2x64xf32>
    %15 = vector.shape_cast %6 : vector<16x64xf32> to vector<2x8x64xf32>
    %16 = vector.shape_cast %14 : vector<2x64xf32> to vector<2x1x64xf32>
    %17 = vector.broadcast %16 : vector<2x1x64xf32> to vector<2x8x64xf32>
    %18 = arith.mulf %15, %17 : vector<2x8x64xf32>
    %19 = vector.shape_cast %18 : vector<2x8x64xf32> to vector<16x64xf32>
    %c0_8 = arith.constant 0 : index
    %c0_9 = arith.constant 0 : index
    %20 = vector.load %arg5[%c0_8, %c0_9] : memref<64x2xf32, #tpu.memory_space<vmem>>, vector<64x2xf32>
    %cst_10 = arith.constant dense<0.000000e+00> : vector<16x2xf32>
    %21 = tpu.matmul %19, %20, %cst_10 {dimension_numbers = #tpu.dot_dimension_numbers<[1], [0], [0], [1], [0, 0, 1, 1], [], []>} : vector<16x64xf32>, vector<64x2xf32>, vector<16x2xf32> -> vector<16x2xf32>
    %22 = vector.shape_cast %21 : vector<16x2xf32> to vector<2x8x2xf32>
    %cst_11 = arith.constant dense<0xFF800000> : vector<2x2xf32>
    %23 = vector.multi_reduction <maximumf>, %22, %cst_11 [1] : vector<2x8x2xf32> to vector<2x2xf32>
    %24 = vector.shape_cast %23 : vector<2x2xf32> to vector<2x1x2xf32>
    %25 = vector.broadcast %24 : vector<2x1x2xf32> to vector<2x8x2xf32>
    %26 = arith.subf %22, %25 : vector<2x8x2xf32>
    %27 = math.exp %26 : vector<2x8x2xf32>
    %cst_12 = arith.constant dense<0.000000e+00> : vector<2x2xf32>
    %28 = vector.multi_reduction <add>, %27, %cst_12 [1] : vector<2x8x2xf32> to vector<2x2xf32>
    %29 = vector.shape_cast %28 : vector<2x2xf32> to vector<2x1x2xf32>
    %30 = tpu.reciprocal %29 {approx = true} : vector<2x1x2xf32> -> vector<2x1x2xf32>
    %31 = vector.broadcast %30 : vector<2x1x2xf32> to vector<2x8x2xf32>
    %32 = arith.mulf %27, %31 : vector<2x8x2xf32>
    %33 = vector.shape_cast %32 : vector<2x8x2xf32> to vector<16x2xf32>
    %c0_13 = arith.constant 0 : index
    %c0_14 = arith.constant 0 : index
    %34 = vector.load %arg6[%c0_13, %c0_14] : memref<2x64xf32, #tpu.memory_space<vmem>>, vector<2x64xf32>
    %cst_15 = arith.constant dense<0.000000e+00> : vector<16x64xf32>
    %35 = tpu.matmul %33, %34, %cst_15 {dimension_numbers = #tpu.dot_dimension_numbers<[1], [0], [0], [1], [0, 0, 1, 1], [], []>} : vector<16x2xf32>, vector<2x64xf32>, vector<16x64xf32> -> vector<16x64xf32>
    %36 = arith.mulf %35, %8 : vector<16x64xf32>
    %37 = vector.shape_cast %36 : vector<16x64xf32> to vector<2x8x64xf32>
    %cst_16 = arith.constant dense<0.000000e+00> : vector<2x64xf32>
    %38 = vector.multi_reduction <add>, %37, %cst_16 [1] : vector<2x8x64xf32> to vector<2x64xf32>
    %39 = arith.truncf %38 : vector<2x64xf32> to vector<2x64xbf16>
    %c0_17 = arith.constant 0 : index
    %c0_18 = arith.constant 0 : index
    %40 = vector.load %arg7[%c0_17, %c0_18] : memref<64x32xbf16, #tpu.memory_space<vmem>>, vector<64x32xbf16>
    %cst_19 = arith.constant dense<0.000000e+00> : vector<2x32xf32>
    %41 = tpu.matmul %39, %40, %cst_19 {dimension_numbers = #tpu.dot_dimension_numbers<[1], [0], [0], [1], [0, 0, 1, 1], [], []>} : vector<2x64xbf16>, vector<64x32xbf16>, vector<2x32xf32> -> vector<2x32xf32>
    %c0_20 = arith.constant 0 : index
    %c0_21 = arith.constant 0 : index
    %42 = vector.load %arg8[%c0_20, %c0_21] : memref<1x32xf32, #tpu.memory_space<vmem>>, vector<1x32xf32>
    %43 = vector.broadcast %42 : vector<1x32xf32> to vector<2x32xf32>
    %44 = arith.addf %41, %43 : vector<2x32xf32>
    %45 = vector.shape_cast %44 : vector<2x32xf32> to vector<1x2x32xf32>
    %c0_22 = arith.constant 0 : index
    %c0_23 = arith.constant 0 : index
    %c0_24 = arith.constant 0 : index
    %46 = vector.load %arg9[%c0_22, %c0_23, %c0_24] : memref<1x2x32xf32, #tpu.memory_space<vmem>>, vector<1x2x32xf32>
    tpu.vector_store %arg9[%c0_22, %c0_23, %c0_24], %45 {strides = array<i32>} : memref<1x2x32xf32, #tpu.memory_space<vmem>>, vector<1x2x32xf32>,
    return
  }
  func.func @transform_0(%arg0: i32) -> (i32, i32) {
    %c0_i32 = arith.constant 0 : i32
    %c0_i32_0 = arith.constant 0 : i32
    return %arg0, %c0_i32 : i32, i32
  }
  func.func @transform_1(%arg0: i32) -> (i32, i32) {
    %c0_i32 = arith.constant 0 : i32
    %c0_i32_0 = arith.constant 0 : i32
    %c0_i32_1 = arith.constant 0 : i32
    return %c0_i32, %c0_i32_0 : i32, i32
  }
  func.func @transform_2(%arg0: i32) -> (i32, i32) {
    %c0_i32 = arith.constant 0 : i32
    %c0_i32_0 = arith.constant 0 : i32
    %c0_i32_1 = arith.constant 0 : i32
    return %c0_i32, %c0_i32_0 : i32, i32
  }
  func.func @transform_3(%arg0: i32) -> (i32, i32) {
    %c0_i32 = arith.constant 0 : i32
    %c0_i32_0 = arith.constant 0 : i32
    %c0_i32_1 = arith.constant 0 : i32
    return %c0_i32, %c0_i32_0 : i32, i32
  }
  func.func @transform_4(%arg0: i32) -> (i32, i32) {
    %c0_i32 = arith.constant 0 : i32
    %c0_i32_0 = arith.constant 0 : i32
    %c0_i32_1 = arith.constant 0 : i32
    return %c0_i32, %c0_i32_0 : i32, i32
  }
  func.func @transform_5(%arg0: i32) -> (i32, i32) {
    %c0_i32 = arith.constant 0 : i32
    %c0_i32_0 = arith.constant 0 : i32
    %c0_i32_1 = arith.constant 0 : i32
    return %c0_i32, %c0_i32_0 : i32, i32
  }
  func.func @transform_6(%arg0: i32) -> (i32, i32) {
    %c0_i32 = arith.constant 0 : i32
    %c0_i32_0 = arith.constant 0 : i32
    %c0_i32_1 = arith.constant 0 : i32
    return %c0_i32, %c0_i32_0 : i32, i32
  }
  func.func @transform_7(%arg0: i32) -> (i32, i32) {
    %c0_i32 = arith.constant 0 : i32
    %c0_i32_0 = arith.constant 0 : i32
    %c0_i32_1 = arith.constant 0 : i32
    return %c0_i32, %c0_i32_0 : i32, i32
  }
  func.func @transform_8(%arg0: i32) -> (i32, i32, i32) {
    %c0_i32 = arith.constant 0 : i32
    %c0_i32_0 = arith.constant 0 : i32
    %c0_i32_1 = arith.constant 0 : i32
    return %arg0, %c0_i32, %c0_i32_0 : i32, i32, i32
  }
}

module attributes {stable_mosaic.version = 11 : i64} {
  func.func @_variable_attention_kernel(%arg0: i32, %arg1: memref<16x32xbf16, #tpu.memory_space<vmem>>, %arg2: memref<32x192xbf16, #tpu.memory_space<vmem>>, %arg3: memref<1x192xf32, #tpu.memory_space<vmem>>, %arg4: memref<8x1xf32, #tpu.memory_space<vmem>>, %arg5: memref<64x2xf32, #tpu.memory_space<vmem>>, %arg6: memref<2x64xf32, #tpu.memory_space<vmem>>, %arg7: memref<64x32xbf16, #tpu.memory_space<vmem>>, %arg8: memref<1x32xf32, #tpu.memory_space<vmem>>, %arg9: memref<1x2x32xf32, #tpu.memory_space<vmem>>) attributes {dimension_semantics = [#tpu.dimension_semantics<parallel>], iteration_bounds = array<i64: 2>, scalar_prefetch = 0 : i64, scratch_operands = 0 : i64, tpu.core_type = #tpu.core_type<tc>, window_params = [{transform_indices = @transform_0, window_bounds = array<i64: 16, 32>}, {pipeline_mode = #tpu.pipeline_mode<synchronous>, transform_indices = @transform_1, window_bounds = array<i64: 32, 192>}, {pipeline_mode = #tpu.pipeline_mode<synchronous>, transform_indices = @transform_2, window_bounds = array<i64: 1, 192>}, {pipeline_mode = #tpu.pipeline_mode<synchronous>, transform_indices = @transform_3, window_bounds = array<i64: 8, 1>}, {pipeline_mode = #tpu.pipeline_mode<synchronous>, transform_indices = @transform_4, window_bounds = array<i64: 64, 2>}, {pipeline_mode = #tpu.pipeline_mode<synchronous>, transform_indices = @transform_5, window_bounds = array<i64: 2, 64>}, {pipeline_mode = #tpu.pipeline_mode<synchronous>, transform_indices = @transform_6, window_bounds = array<i64: 64, 32>}, {pipeline_mode = #tpu.pipeline_mode<synchronous>, transform_indices = @transform_7, window_bounds = array<i64: 1, 32>}, {transform_indices = @transform_8, window_bounds = array<i64: 1, 2, 32>}]} {
    %c0 = arith.constant 0 : index
    %c0_0 = arith.constant 0 : index
    %0 = vector.load %arg1[%c0, %c0_0] : memref<16x32xbf16, #tpu.memory_space<vmem>>, vector<16x32xbf16>
    %c0_1 = arith.constant 0 : index
    %c0_2 = arith.constant 0 : index
    %1 = vector.load %arg2[%c0_1, %c0_2] : memref<32x192xbf16, #tpu.memory_space<vmem>>, vector<32x192xbf16>
    %cst = arith.constant dense<0.000000e+00> : vector<16x192xf32>
    %2 = tpu.matmul %0, %1, %cst {dimension_numbers = #tpu.dot_dimension_numbers<[1], [0], [0], [1], [0, 0, 1, 1], [], []>} : vector<16x32xbf16>, vector<32x192xbf16>, vector<16x192xf32> -> vector<16x192xf32>
    %c0_3 = arith.constant 0 : index
    %c0_4 = arith.constant 0 : index
    %3 = vector.load %arg3[%c0_3, %c0_4] : memref<1x192xf32, #tpu.memory_space<vmem>>, vector<1x192xf32>
    %4 = vector.broadcast %3 : vector<1x192xf32> to vector<16x192xf32>
    %5 = arith.addf %2, %4 : vector<16x192xf32>
    %6 = vector.extract_strided_slice %5 {offsets = [0, 0], sizes = [16, 64], strides = [1, 1]} : vector<16x192xf32> to vector<16x64xf32>
    %7 = vector.extract_strided_slice %5 {offsets = [0, 64], sizes = [16, 64], strides = [1, 1]} : vector<16x192xf32> to vector<16x64xf32>
    %8 = vector.extract_strided_slice %5 {offsets = [0, 128], sizes = [16, 64], strides = [1, 1]} : vector<16x192xf32> to vector<16x64xf32>
    %c0_5 = arith.constant 0 : index
    %c0_6 = arith.constant 0 : index
    %9 = vector.load %arg4[%c0_5, %c0_6] : memref<8x1xf32, #tpu.memory_space<vmem>>, vector<8x1xf32>
    %10 = vector.shape_cast %9 : vector<8x1xf32> to vector<1x8x1xf32>
    %11 = vector.shape_cast %7 : vector<16x64xf32> to vector<2x8x64xf32>
    %12 = vector.broadcast %10 : vector<1x8x1xf32> to vector<2x8x64xf32>
    %13 = arith.mulf %11, %12 : vector<2x8x64xf32>
    %cst_7 = arith.constant dense<0.000000e+00> : vector<2x64xf32>
    %14 = vector.multi_reduction <add>, %13, %cst_7 [1] : vector<2x8x64xf32> to vector<2x64xf32>
    %15 = vector.shape_cast %6 : vector<16x64xf32> to vector<2x8x64xf32>
    %16 = vector.shape_cast %14 : vector<2x64xf32> to vector<2x1x64xf32>
    %17 = vector.broadcast %16 : vector<2x1x64xf32> to vector<2x8x64xf32>
    %18 = arith.mulf %15, %17 : vector<2x8x64xf32>
    %19 = vector.shape_cast %18 : vector<2x8x64xf32> to vector<16x64xf32>
    %c0_8 = arith.constant 0 : index
    %c0_9 = arith.constant 0 : index
    %20 = vector.load %arg5[%c0_8, %c0_9] : memref<64x2xf32, #tpu.memory_space<vmem>>, vector<64x2xf32>
    %cst_10 = arith.constant dense<0.000000e+00> : vector<16x2xf32>
    %21 = tpu.matmul %19, %20, %cst_10 {dimension_numbers = #tpu.dot_dimension_numbers<[1], [0], [0], [1], [0, 0, 1, 1], [], []>} : vector<16x64xf32>, vector<64x2xf32>, vector<16x2xf32> -> vector<16x2xf32>
    %22 = vector.shape_cast %21 : vector<16x2xf32> to vector<2x8x2xf32>
    %cst_11 = arith.constant dense<0xFF800000> : vector<2x2xf32>
    %23 = vector.multi_reduction <maximumf>, %22, %cst_11 [1] : vector<2x8x2xf32> to vector<2x2xf32>
    %24 = vector.shape_cast %23 : vector<2x2xf32> to vector<2x1x2xf32>
    %25 = vector.broadcast %24 : vector<2x1x2xf32> to vector<2x8x2xf32>
    %26 = arith.subf %22, %25 : vector<2x8x2xf32>
    %27 = math.exp %26 : vector<2x8x2xf32>
    %cst_12 = arith.constant dense<0.000000e+00> : vector<2x2xf32>
    %28 = vector.multi_reduction <add>, %27, %cst_12 [1] : vector<2x8x2xf32> to vector<2x2xf32>
    %29 = vector.shape_cast %28 : vector<2x2xf32> to vector<2x1x2xf32>
    %30 = tpu.reciprocal %29 {approx = true} : vector<2x1x2xf32> -> vector<2x1x2xf32>
    %31 = vector.broadcast %30 : vector<2x1x2xf32> to vector<2x8x2xf32>
    %32 = arith.mulf %27, %31 : vector<2x8x2xf32>
    %33 = vector.shape_cast %32 : vector<2x8x2xf32> to vector<16x2xf32>
    %c0_13 = arith.constant 0 : index
    %c0_14 = arith.constant 0 : index
    %34 = vector.load %arg6[%c0_13, %c0_14] : memref<2x64xf32, #tpu.memory_space<vmem>>, vector<2x64xf32>
    %cst_15 = arith.constant dense<0.000000e+00> : vector<16x64xf32>
    %35 = tpu.matmul %33, %34, %cst_15 {dimension_numbers = #tpu.dot_dimension_numbers<[1], [0], [0], [1], [0, 0, 1, 1], [], []>} : vector<16x2xf32>, vector<2x64xf32>, vector<16x64xf32> -> vector<16x64xf32>
    %36 = arith.mulf %35, %8 : vector<16x64xf32>
    %37 = vector.shape_cast %36 : vector<16x64xf32> to vector<2x8x64xf32>
    %cst_16 = arith.constant dense<0.000000e+00> : vector<2x64xf32>
    %38 = vector.multi_reduction <add>, %37, %cst_16 [1] : vector<2x8x64xf32> to vector<2x64xf32>
    %39 = arith.truncf %38 : vector<2x64xf32> to vector<2x64xbf16>
    %c0_17 = arith.constant 0 : index
    %c0_18 = arith.constant 0 : index
    %40 = vector.load %arg7[%c0_17, %c0_18] : memref<64x32xbf16, #tpu.memory_space<vmem>>, vector<64x32xbf16>
    %cst_19 = arith.constant dense<0.000000e+00> : vector<2x32xf32>
    %41 = tpu.matmul %39, %40, %cst_19 {dimension_numbers = #tpu.dot_dimension_numbers<[1], [0], [0], [1], [0, 0, 1, 1], [], []>} : vector<2x64xbf16>, vector<64x32xbf16>, vector<2x32xf32> -> vector<2x32xf32>
    %c0_20 = arith.constant 0 : index
    %c0_21 = arith.constant 0 : index
    %42 = vector.load %arg8[%c0_20, %c0_21] : memref<1x32xf32, #tpu.memory_space<vmem>>, vector<1x32xf32>
    %43 = vector.broadcast %42 : vector<1x32xf32> to vector<2x32xf32>
    %44 = arith.addf %41, %43 : vector<2x32xf32>
    %45 = vector.shape_cast %44 : vector<2x32xf32> to vector<1x2x32xf32>
    %c0_22 = arith.constant 0 : index
    %c0_23 = arith.constant 0 : index
    %c0_24 = arith.constant 0 : index
    %46 = vector.load %arg9[%c0_22, %c0_23, %c0_24] : memref<1x2x32xf32, #tpu.memory_space<vmem>>, vector<1x2x32xf32>
    tpu.vector_store %arg9[%c0_22, %c0_23, %c0_24], %45 {strides = array<i32>} : memref<1x2x32xf32, #tpu.memory_space<vmem>>, vector<1x2x32xf32>,
    return
  }
  func.func @transform_0(%arg0: i32) -> (i32, i32) {
    %c0_i32 = arith.constant 0 : i32
    %c0_i32_0 = arith.constant 0 : i32
    return %arg0, %c0_i32 : i32, i32
  }
  func.func @transform_1(%arg0: i32) -> (i32, i32) {
    %c0_i32 = arith.constant 0 : i32
    %c0_i32_0 = arith.constant 0 : i32
    %c0_i32_1 = arith.constant 0 : i32
    return %c0_i32, %c0_i32_0 : i32, i32
  }
  func.func @transform_2(%arg0: i32) -> (i32, i32) {
    %c0_i32 = arith.constant 0 : i32
    %c0_i32_0 = arith.constant 0 : i32
    %c0_i32_1 = arith.constant 0 : i32
    return %c0_i32, %c0_i32_0 : i32, i32
  }
  func.func @transform_3(%arg0: i32) -> (i32, i32) {
    %c0_i32 = arith.constant 0 : i32
    %c0_i32_0 = arith.constant 0 : i32
    %c0_i32_1 = arith.constant 0 : i32
    return %c0_i32, %c0_i32_0 : i32, i32
  }
  func.func @transform_4(%arg0: i32) -> (i32, i32) {
    %c0_i32 = arith.constant 0 : i32
    %c0_i32_0 = arith.constant 0 : i32
    %c0_i32_1 = arith.constant 0 : i32
    return %c0_i32, %c0_i32_0 : i32, i32
  }
  func.func @transform_5(%arg0: i32) -> (i32, i32) {
    %c0_i32 = arith.constant 0 : i32
    %c0_i32_0 = arith.constant 0 : i32
    %c0_i32_1 = arith.constant 0 : i32
    return %c0_i32, %c0_i32_0 : i32, i32
  }
  func.func @transform_6(%arg0: i32) -> (i32, i32) {
    %c0_i32 = arith.constant 0 : i32
    %c0_i32_0 = arith.constant 0 : i32
    %c0_i32_1 = arith.constant 0 : i32
    return %c0_i32, %c0_i32_0 : i32, i32
  }
  func.func @transform_7(%arg0: i32) -> (i32, i32) {
    %c0_i32 = arith.constant 0 : i32
    %c0_i32_0 = arith.constant 0 : i32
    %c0_i32_1 = arith.constant 0 : i32
    return %c0_i32, %c0_i32_0 : i32, i32
  }
  func.func @transform_8(%arg0: i32) -> (i32, i32, i32) {
    %c0_i32 = arith.constant 0 : i32
    %c0_i32_0 = arith.constant 0 : i32
    %c0_i32_1 = arith.constant 0 : i32
    return %arg0, %c0_i32, %c0_i32_0 : i32, i32, i32
  }
}

</mosaic_0001>

<bundles_post_ra>
// kernel: tpu_custom_call.1
= control target key start
LH: loop header
LB: loop body
LE: loop exit
PB: predicated region body
PF: predicated region fallthrough
CT: control target
= control target key end

     0   :  { %13 = vsyncpa [#allocation3], 0  ;;  %s1077_s0 = inlined_call_operand.vmem [shape: bf16[32,32], index: 0, kind: input, shape index: {}]   ;;  %s1078_s1 = inlined_call_operand.vmem [shape: bf16[32,192], index: 1, kind: input, shape index: {}]   ;;  %s1079_s2 = inlined_call_operand.vmem [shape: f32[1,192], index: 2, kind: input, shape index: {}]   ;;  %s1080_s3 = inlined_call_operand.vmem [shape: f32[8,1], index: 3, kind: input, shape index: {}]   ;;  %s1081_s4 = inlined_call_operand.vmem [shape: f32[64,2], index: 4, kind: input, shape index: {}]   ;;  %s1082_s5 = inlined_call_operand.vmem [shape: f32[2,64], index: 5, kind: input, shape index: {}]   ;;  %s1083_s6 = inlined_call_operand.vmem [shape: bf16[64,32], index: 6, kind: input, shape index: {}]   ;;  %s1084_s7 = inlined_call_operand.vmem [shape: f32[1,32], index: 7, kind: input, shape index: {}]   ;;  %s1085_s8 = inlined_call_operand.hbm [shape: f32[2,2,32], index: 8, kind: output, shape index: {}]  }
   0x1   :  { %15 = vsyncpa [#allocation3 + $0x1], 0  ;;  %s900_s27 = smov 0   ;;  %s902_s28 = smov 0  }
   0x2   :  { %s904_s29 = smov 0   ;;  %s906_s30 = smov 0  }
   0x3 LB: > { %s673_s9 = sadd.s32 4294967295, %s851_s30   ;;  %s674_s10 = sadd.s32 4294967294, %s851_s30   ;;  %s851_s30 = sphi %s906_s30, %s1091_s30   ;;  %s847_s29 = sphi %s904_s29, %s1090_s29   ;;  %s843_s28 = sphi %s902_s28, %s1089_s28   ;;  %s839_s27 = sphi %s900_s27, %s1088_s27  }
   0x4   : > { %s923_s11 = sadd.s32 1, %s851_s30   ;;  %s201_s12 = sadd.s32 1, %s847_s29 }
   0x5   : > { %s198_s13 = ssub.s32 %s851_s30, %s923_s11  ;;  %p211_p0 = scmp.ne.s32.totalorder %s847_s29, %s843_s28 }
   0x6   : > { %p199_p1 = scmp.eq.s32.totalorder %s198_s13, 0  ;;  %p212_p2 = scmp.eq.s32.totalorder %s673_s9, 1 }
   0x7   : > { %p217_p3 = scmp.ne.s32.totalorder %s843_s28, %s839_s27  ;;  %p218_p4 = scmp.eq.s32.totalorder %s674_s10, 1 }
   0x8   : > { %s933_s14 = scalar_select %p199_p1, %s847_s29, %s201_s12  }
   0x9   : > { %p935_p5 = por %p212_p2, %p211_p0  ;;  %p939_p6 = por %p218_p4, %p217_p3 }
   0xa   : > { %p677_p7 = scmp.ge.s32.totalorder %s851_s30, 1  ;;  %p266_p8 = scmp.lt.s32.totalorder %s851_s30, 3 }
   0xc   : > { %p267_p9 = pnand %p677_p7, %p266_p8 }
   0xd   : > { %s957_s25 = sshll.u32 (!%p267_p9), %s673_s9, 1  ;;  %s854_s22 = smov (!%p267_p9), 64  }
   0xe   : > { %270 = sbr.rel (%p267_p9) target bundleno = 769 (0x301), region = 52  ;;  %p301_p10 = scmp.lt.s32.totalorder (!%p267_p9), %s957_s25, 3 }
   0xf   : > { %s297_s18 = sand.u32 (!%p267_p9), 1, %s843_s28   ;;  %s610_s21 = scalar_lea.hbm (!%p267_p9), %s1085_s8, %s957_s25 }
  0x10   : > { %s614_s10 = sshll.u32 (!%p267_p9), %s610_s21, 4  ;;  %s615_s10 = int_to_ptr.hbm [resolvable:$true] %s614_s10 }
  0x13   : > { %v695_v0 = vld [vmem:[%s1078_s1 + $0x10] sm:$0xf]  ;;  %v733_v1 = vld [vmem:[%s1078_s1 + $0x14] sm:$0xf0]  ;;  %v687_v2 = vld [vmem:[%s1078_s1] sm:$0xf] }
  0x14   : > { %v696_v3 = vor.u32 %v733_v1, %v695_v0  ;;  %v731_v4 = vld [vmem:[%s1078_s1 + $0x4] sm:$0xf0]  ;;  %v376_v5 = vld [vmem:[%s1080_s3] sm:$0xff]  ;;  %v853_v6 = vmov 0   ;;  %s302_s12 = scalar_select %p301_p10, %s957_s25, 3  ;;  %vm344_vm0 = vcmask 261120  }
  0x15   : > { %779 = vset.pattern.permute.xlu0 %v853_v6  ;;  %v688_v7 = vor.u32 %v731_v4, %v687_v2  ;;  %v974_v9 = vld [vmem:[%s1079_s2] sm:$0x3]  ;;  %v416_v10 = vld [vmem:[%s1081_s4 + $0x38] sm:$0xff]  ;;  %v415_v11 = vld [vmem:[%s1081_s4 + $0x30] sm:$0xff]  ;;  %vm384_vm1 = vcmask 1048064   ;;  %vm417_vm2 = vcmask 523264  }
  0x16   : > { %354 = vmatpush.bf16.msra.mxu0 %v696_v3  ;;  %379 = vperm.xlu0 %779, %v376_v5   ;;  %s680_s13 = sshll.u32 %s302_s12, 2  ;;  %v414_v12 = vld [vmem:[%s1081_s4 + $0x28] sm:$0xff]  ;;  %v315_v13 = vperm.slane %v974_v9, 0  ;;  %v413_v14 = vld [vmem:[%s1081_s4 + $0x20] sm:$0xff]  ;;  %v412_v17 = vld [vmem:[%s1081_s4 + $0x18] sm:$0xff]  ;;  %vm447_vm3 = vcmask 15360  }
  0x17   : > { %s304_s9 = scalar_lea.vmem %s1077_s0, %s680_s13  ;;  %432 = vmatpush.msra.mxu2 %v416_v10  ;;  %v411_v19 = vld [vmem:[%s1081_s4 + $0x10] sm:$0xff]  ;;  %v410_v21 = vld [vmem:[%s1081_s4 + $0x8] sm:$0xff]  ;;  %v409_v39 = vld [vmem:[%s1081_s4] sm:$0xff]  ;;  %vm493_vm4 = vcmask 1041408   ;;  %vm554_vm5 = vcmask 1041409   ;;  %vm597_vm6 = vcmask 254976  }
  0x18   : > { %v967_v8 = vld [vmem:[%s304_s9] sm:$0xff]  ;;  %v732_v46 = vld [vmem:[%s1078_s1 + $0x14] sm:$0xf]  ;;  %v697_v47 = vld [vmem:[%s1078_s1 + $0x18] sm:$0xf0]  ;;  %s678_s9 = sshll.u32 %s297_s18, 1 }
  0x19   : > { %433 = vmatpush.msra.mxu2 %v415_v11  ;;  %v700_v49 = vor.u32 %v732_v46, %v697_v47  ;;  %v730_v51 = vld [vmem:[%s1078_s1 + $0x4] sm:$0xf]  ;;  %v689_v52 = vld [vmem:[%s1078_s1 + $0x8] sm:$0xf0]  ;;  %v486_v57 = vld [vmem:[%s1082_s5] sm:$0x3] }
  0x1a   : > { %355 = vmatpush.bf16.msra.mxu0 %v688_v7  ;;  %v692_v54 = vor.u32 %v730_v51, %v689_v52  ;;  %705 = vmatpush.msk.msra.mxu3 %vm493_vm4, %v486_v57  ;;  %s299_s24 = scalar_lea.vmem [#allocation2], %s678_s9  ;;  %s600_s12 = scalar_lea.sflag [#allocation3], %s297_s18 }
  0x1b   : > { %434 = vmatpush.msra.mxu2 %v414_v12  ;;  %368 = vmatpush.bf16.msra.mxu1 %v700_v49  ;;  %s612_s26 = sshll.u32 %s299_s24, 4  ;;  %s803_s13 = sshra.s32 %s615_s10, 4  ;;  %s613_s26 = int_to_ptr.vmem [resolvable:$true] %s612_s26  ;;  %s804_s13 = int_to_ptr.hbm [resolvable:$true] %s803_s13 }
  0x1c   : > { %s805_s17 = scalar_lea.hbm %s804_s13, 2  ;;  %s809_s9 = scalar_lea.hbm %s1085_s8, 4 }
  0x1d   : > { %701 = vmatmul.msk.bf16.vlgmr.msra.gmra.mxu0 %vm344_vm0, %v967_v8  ;;  %435 = vmatpush.msra.mxu2 %v413_v14  ;;  %p806_p11 = scmp.ne.s32.totalorder %s804_s13, %s805_s17  ;;  %p810_p0 = scmp.lt.s32.totalorder %s804_s13, %s1085_s8 }
  0x1e   : > { %p811_p1 = scmp.lt.s32.totalorder %s809_s9, %s805_s17 }
  0x1f   : > { %436 = vmatpush.msra.mxu2 %v412_v17  ;;  %369 = vmatpush.bf16.msra.mxu1 %v692_v54  ;;  %p807_p12 = pnand %p806_p11, %p935_p5 }
  0x20   : > { %p812_p2 = por %p811_p1, %p810_p0 }
  0x21   : > { %437 = vmatpush.msra.mxu2 %v411_v19  ;;  %p808_p13 = pneg %p807_p12 }
  0x22   : > { %702 = vmatmul.msk.bf16.vlgmr.msra.gmra.mxu1 %vm344_vm0, %v967_v8 }
  0x23   : > { %438 = vmatpush.msra.mxu2 %v410_v21  ;;  %p813_p3 = pnand %p812_p2, %p808_p13 }
  0x25   : > { %439 = vmatpush.msra.mxu2 %v409_v39 }
  0x88   : > { %v380_v16 = vpop.permute.xlu0 %379 }
  0x9a   : > { %v357_v15 = vpop.f32.mrf.mxu0 }
  0x9b   : > { %v358_v18 = vadd.f32 %v357_v15, %v315_v13 }
  0x9d   : > { %v382_v20 = vmul.f32 %v380_v16, %v358_v18 }
  0x9f   : > { %v385_v22 = vsel %vm384_vm1, %v382_v20, 0.0 }
  0xa0   : > { %v386_v23 = vrot.slane %v385_v22, 4 }
  0xa2   : > { %v387_v24 = vadd.f32 %v386_v23, %v385_v22  ;;  %v359_v25 = vpop.f32.mrf.mxu0 }
  0xa3   : > { %v360_v26 = vadd.f32 %v359_v25, %v315_v13 }
  0xa4   : > { %v388_v27 = vrot.slane %v387_v24, 2 }
  0xa5   : > { %v383_v28 = vmul.f32 %v380_v16, %v360_v26 }
  0xa6   : > { %v389_v29 = vadd.f32 %v388_v27, %v387_v24 }
  0xa7   : > { %v392_v30 = vsel %vm384_vm1, %v383_v28, 0.0  ;;  %v737_v28 = vld [vmem:[%s1083_s6 + $0x18] sm:$0xff] }
  0xa8   : > { %v393_v31 = vrot.slane %v392_v30, 4  ;;  %v390_v32 = vrot.slane %v389_v29, 1  ;;  %588 = vmatpush.bf16.msrb.mxu3 %v737_v28 }
  0xaa   : > { %v391_v33 = vadd.f32 %v390_v32, %v389_v29  ;;  %v394_v34 = vadd.f32 %v393_v31, %v392_v30  ;;  %v736_v29 = vld [vmem:[%s1083_s6 + $0x10] sm:$0xff]  ;;  %v735_v30 = vld [vmem:[%s1083_s6 + $0x8] sm:$0xff]  ;;  %v316_v31 = vperm.slane %v974_v9, 1  ;;  %v371_v32 = vpop.f32.mrf.mxu1 }
  0xac   : > { %401 = vrot.lane.b32.xlu0 %v391_v33, %s854_s22  ;;  %v395_v35 = vrot.slane %v394_v34, 2  ;;  %589 = vmatpush.bf16.msrb.mxu3 %v736_v29  ;;  %v734_v33 = vld [vmem:[%s1083_s6] sm:$0xff] }
  0xae   : > { %v396_v36 = vadd.f32 %v395_v35, %v394_v34  ;;  %v372_v34 = vadd.f32 %v371_v32, %v316_v31 }
  0xb0   : > { %v397_v37 = vrot.slane %v396_v36, 1  ;;  %590 = vmatpush.bf16.msrb.mxu3 %v735_v30 }
  0xb2   : > { %v398_v38 = vadd.f32 %v397_v37, %v396_v36 }
  0xb4   : > { %403 = vrot.lane.b32.xlu1 %v398_v38, %s854_s22  ;;  %591 = vmatpush.bf16.msrb.mxu3 %v734_v33  ;;  %v373_v38 = vpop.f32.mrf.mxu1 }
 0x11e   : > { %v402_v40 = vpop.permute.xlu0 %401 }
 0x11f   : > { %v407_v41 = vmul.f32 %v402_v40, %v358_v18 }
 0x121   : > { %703 = vmatmul.msk.f32.vlgmr.msra.gmra.mxu2 %vm417_vm2, %v407_v41  ;;  %v374_v41 = vadd.f32 %v373_v38, %v316_v31 }
 0x126   : > { %v404_v42 = vpop.permute.xlu1 %403 }
 0x127   : > { %v408_v43 = vmul.f32 %v404_v42, %v360_v26 }
 0x129   : > { %704 = vmatmul.msk.f32.gmra.mxu2 %vm417_vm2, %v408_v43 }
 0x1a4   : > { %v441_v44 = vpop.f32.mrf.mxu2 }
 0x1a5   : > { %v448_v45 = vsel %vm447_vm3, %v441_v44, -inf }
 0x1a6   : > { %v449_v48 = vrot.slane %v448_v45, 4 }
 0x1a8   : > { %v450_v50 = vmax.f32 %v448_v45, %v449_v48 }
 0x1aa   : > { %v451_v53 = vrot.slane %v450_v50, 2 }
 0x1ac   : > { %v452_v55 = vmax.f32 %v450_v50, %v451_v53  ;;  %v444_v56 = vpop.f32.mrf.mxu2 }
 0x1ad   : > { %v455_v58 = vsel %vm447_vm3, %v444_v56, -inf }
 0x1ae   : > { %v453_v59 = vrot.slane %v452_v55, 1  ;;  %v456_v60 = vrot.slane %v455_v58, 4 }
 0x1b0   : > { %v454_v61 = vmax.f32 %v452_v55, %v453_v59  ;;  %v457_v62 = vmax.f32 %v455_v58, %v456_v60  ;;  %v780_v60 = vld [vmem:[%s1084_s7] ss:$0 sm:$0xff] }
 0x1b2   : > { %v462_v63 = vsub.f32 %v441_v44, %v454_v61  ;;  %v458_v0 = vrot.slane %v457_v62, 2 }
 0x1b4   : > { %v464_v1 = vmul.f32 1.442695, %v462_v63  ;;  %v459_v2 = vmax.f32 %v457_v62, %v458_v0 }
 0x1b6   : > { %781 = vpow2.f32 %v464_v1  ;;  %v460_v3 = vrot.slane %v459_v2, 1 }
 0x1b8   : > { %v461_v4 = vmax.f32 %v459_v2, %v460_v3 }
 0x1ba   : > { %v463_v5 = vsub.f32 %v444_v56, %v461_v4 }
 0x1bc   : > { %v782_v6 = vpop.eup %781  ;;  %v466_v7 = vmul.f32 1.442695, %v463_v5 }
 0x1bd   : > { %v468_v10 = vsel %vm447_vm3, %v782_v6, 0.0 }
 0x1be   : > { %v469_v11 = vrot.slane %v468_v10, 4  ;;  %783 = vpow2.f32 %v466_v7 }
 0x1c0   : > { %v470_v12 = vadd.f32 %v469_v11, %v468_v10 }
 0x1c2   : > { %v471_v13 = vrot.slane %v470_v12, 2 }
 0x1c4   : > { %v784_v14 = vpop.eup %783  ;;  %v472_v8 = vadd.f32 %v471_v13, %v470_v12 }
 0x1c5   : > { %v475_v15 = vsel %vm447_vm3, %v784_v14, 0.0 }
 0x1c6   : > { %v476_v16 = vrot.slane %v475_v15, 4  ;;  %v473_v17 = vrot.slane %v472_v8, 1 }
 0x1c8   : > { %v477_v18 = vadd.f32 %v476_v16, %v475_v15  ;;  %v474_v19 = vadd.f32 %v473_v17, %v472_v8 }
 0x1ca   : > { %v478_v20 = vrot.slane %v477_v18, 2  ;;  %785 = vrcp.f32 %v474_v19 }
 0x1cc   : > { %v479_v21 = vadd.f32 %v478_v20, %v477_v18 }
 0x1ce   : > { %v480_v22 = vrot.slane %v479_v21, 1 }
 0x1d0   : > { %v786_v23 = vpop.eup %785  ;;  %v481_v24 = vadd.f32 %v480_v22, %v479_v21 }
 0x1d1   : > { %v484_v25 = vmul.f32 %v786_v23, %v782_v6 }
 0x1d2   : > { %787 = vrcp.f32 %v481_v24 }
 0x1d3   : > { %706 = vmatmul.msk.f32.vlgmr.msra.gmra.mxu3 %vm447_vm3, %v484_v25 }
 0x1d8   : > { %v788_v26 = vpop.eup %787 }
 0x1d9   : > { %v485_v27 = vmul.f32 %v788_v26, %v784_v14 }
 0x1db   : > { %707 = vmatmul.msk.f32.gmra.mxu3 %vm447_vm3, %v485_v27 }
 0x256   : > { %v514_v35 = vpop.f32.mrf.mxu3 }
 0x257   : > { %v520_v36 = vmul.f32 %v514_v35, %v372_v34 }
 0x259   : > { %v522_v37 = vsel %vm417_vm2, %v520_v36, 0.0 }
 0x25a   : > { %v523_v39 = vrot.slane %v522_v37, 4 }
 0x25c   : > { %v524_v40 = vadd.f32 %v523_v39, %v522_v37 }
 0x25e   : > { %v525_v42 = vrot.slane %v524_v40, 2  ;;  %v517_v43 = vpop.f32.mrf.mxu3 }
 0x25f   : > { %v521_v44 = vmul.f32 %v517_v43, %v374_v41 }
 0x260   : > { %v526_v45 = vadd.f32 %v525_v42, %v524_v40 }
 0x261   : > { %v529_v9 = vsel %vm417_vm2, %v521_v44, 0.0 }
 0x262   : > { %v530_v46 = vrot.slane %v529_v9, 4  ;;  %v527_v47 = vrot.slane %v526_v45, 1 }
 0x264   : > { %v531_v48 = vadd.f32 %v530_v46, %v529_v9  ;;  %v528_v50 = vadd.f32 %v527_v47, %v526_v45 }
 0x266   : > { %v532_v49 = vrot.slane %v531_v48, 2  ;;  %v536_v53 = vpack.c.bf16 %v528_v50, %v528_v50 }
 0x268   : > { %v533_v51 = vadd.f32 %v532_v49, %v531_v48  ;;  %v552_v56 = vunpack.c.l.b16 %v536_v53 }
 0x26a   : > { %v534_v52 = vrot.slane %v533_v51, 1 }
 0x26c   : > { %v535_v54 = vadd.f32 %v534_v52, %v533_v51 }
 0x26e   : > { %v537_v55 = vpack.c.bf16 %v535_v54, %v535_v54 }
 0x270   : > { %v553_v57 = vunpack.c.l.b16 %v537_v55 }
 0x272   : > { %v555_v58 = vsel %vm554_vm5, %v553_v57, %v552_v56 }
 0x273   : > { %v556_v59 = vpack.c.b16 %v555_v58, %v555_v58 }
 0x275   : > { %724 = vmatmul.msk.bf16.vlgmr.msrb.gmra.mxu3 %vm417_vm2, %v556_v59 }
 0x2f8   : > { %v593_v61 = vpop.f32.mrf.mxu3 }
 0x2f9   : > { %v594_v62 = vadd.f32 %v780_v60, %v593_v61 }
 0x2fb   : > { %598 = vst.msk [vmem:[%s299_s24] sm:$0x3] %vm597_vm6, %v594_v62 }
 0x2fc   : > { %816 = shalt.err (!%p813_p3)
}
 0x2fd   : > { %738 = dma.vmem_to_hbm [thread:$0]  (%p935_p5), %s613_s26, 32, %s615_s10, %s600_s12  }
 0x300   : > { %v595_v63 = vpop.f32.mrf.mxu3 }
 0x301 PF: > { %p744_p4 = scmp.ge.s32.totalorder %s851_s30, 2  ;;  %s626_s18 = sand.u32 1, %s839_s27  }
 0x302   : > { %s627_s22 = scalar_lea.sflag [#allocation3], %s626_s18 }
 0x303   : > { %p741_p7 = pnand %p744_p4, %p939_p6 }
 0x305   : > { %p742_p8 = pneg %p741_p7 }
 0x307   : > { %834 = dma.done.wait (%p742_p8), %s627_s22, 32  }
 0x308   : > { %836 = vsyncadd (%p742_p8), %s627_s22, 4294967264  ;;  %p18_p9 = scmp.ge.s32.totalorder %s923_s11, 4   ;;  %s1088_s27 = smov %s843_s28 }
 0x309   : > { %s1089_s28 = smov %s847_s29  ;;  %s1090_s29 = smov %s933_s14 }
 0x30a   : > { %s1091_s30 = smov %s923_s11  ;;  %20 = sbr.rel (!%p18_p9) target bundleno = 3 (0x3), region = 87 }
 0x30f   :  { %633 = vsyncpa [#allocation3], 1 }
 0x310   :  { %635 = vsyncpa [#allocation3 + $0x1], 1 }

// kernel: tpu_custom_call.1
= control target key start
LH: loop header
LB: loop body
LE: loop exit
PB: predicated region body
PF: predicated region fallthrough
CT: control target
= control target key end

     0   :  { %13 = vsyncpa [#allocation3], 0  ;;  %s1077_s0 = inlined_call_operand.vmem [shape: bf16[32,32], index: 0, kind: input, shape index: {}]   ;;  %s1078_s1 = inlined_call_operand.vmem [shape: bf16[32,192], index: 1, kind: input, shape index: {}]   ;;  %s1079_s2 = inlined_call_operand.vmem [shape: f32[1,192], index: 2, kind: input, shape index: {}]   ;;  %s1080_s3 = inlined_call_operand.vmem [shape: f32[8,1], index: 3, kind: input, shape index: {}]   ;;  %s1081_s4 = inlined_call_operand.vmem [shape: f32[64,2], index: 4, kind: input, shape index: {}]   ;;  %s1082_s5 = inlined_call_operand.vmem [shape: f32[2,64], index: 5, kind: input, shape index: {}]   ;;  %s1083_s6 = inlined_call_operand.vmem [shape: bf16[64,32], index: 6, kind: input, shape index: {}]   ;;  %s1084_s7 = inlined_call_operand.vmem [shape: f32[1,32], index: 7, kind: input, shape index: {}]   ;;  %s1085_s8 = inlined_call_operand.hbm [shape: f32[2,2,32], index: 8, kind: output, shape index: {}]  }
   0x1   :  { %15 = vsyncpa [#allocation3 + $0x1], 0  ;;  %s900_s27 = smov 0   ;;  %s902_s28 = smov 0  }
   0x2   :  { %s904_s29 = smov 0   ;;  %s906_s30 = smov 0  }
   0x3 LB: > { %s673_s9 = sadd.s32 4294967295, %s851_s30   ;;  %s674_s10 = sadd.s32 4294967294, %s851_s30   ;;  %s851_s30 = sphi %s906_s30, %s1091_s30   ;;  %s847_s29 = sphi %s904_s29, %s1090_s29   ;;  %s843_s28 = sphi %s902_s28, %s1089_s28   ;;  %s839_s27 = sphi %s900_s27, %s1088_s27  }
   0x4   : > { %s923_s11 = sadd.s32 1, %s851_s30   ;;  %s201_s12 = sadd.s32 1, %s847_s29 }
   0x5   : > { %s198_s13 = ssub.s32 %s851_s30, %s923_s11  ;;  %p211_p0 = scmp.ne.s32.totalorder %s847_s29, %s843_s28 }
   0x6   : > { %p199_p1 = scmp.eq.s32.totalorder %s198_s13, 0  ;;  %p212_p2 = scmp.eq.s32.totalorder %s673_s9, 1 }
   0x7   : > { %p217_p3 = scmp.ne.s32.totalorder %s843_s28, %s839_s27  ;;  %p218_p4 = scmp.eq.s32.totalorder %s674_s10, 1 }
   0x8   : > { %s933_s14 = scalar_select %p199_p1, %s847_s29, %s201_s12  }
   0x9   : > { %p935_p5 = por %p212_p2, %p211_p0  ;;  %p939_p6 = por %p218_p4, %p217_p3 }
   0xa   : > { %p677_p7 = scmp.ge.s32.totalorder %s851_s30, 1  ;;  %p266_p8 = scmp.lt.s32.totalorder %s851_s30, 3 }
   0xc   : > { %p267_p9 = pnand %p677_p7, %p266_p8 }
   0xd   : > { %s957_s25 = sshll.u32 (!%p267_p9), %s673_s9, 1  ;;  %s854_s22 = smov (!%p267_p9), 64  }
   0xe   : > { %270 = sbr.rel (%p267_p9) target bundleno = 769 (0x301), region = 52  ;;  %p301_p10 = scmp.lt.s32.totalorder (!%p267_p9), %s957_s25, 3 }
   0xf   : > { %s297_s18 = sand.u32 (!%p267_p9), 1, %s843_s28   ;;  %s610_s21 = scalar_lea.hbm (!%p267_p9), %s1085_s8, %s957_s25 }
  0x10   : > { %s614_s10 = sshll.u32 (!%p267_p9), %s610_s21, 4  ;;  %s615_s10 = int_to_ptr.hbm [resolvable:$true] %s614_s10 }
  0x13   : > { %v695_v0 = vld [vmem:[%s1078_s1 + $0x10] sm:$0xf]  ;;  %v733_v1 = vld [vmem:[%s1078_s1 + $0x14] sm:$0xf0]  ;;  %v687_v2 = vld [vmem:[%s1078_s1] sm:$0xf] }
  0x14   : > { %v696_v3 = vor.u32 %v733_v1, %v695_v0  ;;  %v731_v4 = vld [vmem:[%s1078_s1 + $0x4] sm:$0xf0]  ;;  %v376_v5 = vld [vmem:[%s1080_s3] sm:$0xff]  ;;  %v853_v6 = vmov 0   ;;  %s302_s12 = scalar_select %p301_p10, %s957_s25, 3  ;;  %vm344_vm0 = vcmask 261120  }
  0x15   : > { %779 = vset.pattern.permute.xlu0 %v853_v6  ;;  %v688_v7 = vor.u32 %v731_v4, %v687_v2  ;;  %v974_v9 = vld [vmem:[%s1079_s2] sm:$0x3]  ;;  %v416_v10 = vld [vmem:[%s1081_s4 + $0x38] sm:$0xff]  ;;  %v415_v11 = vld [vmem:[%s1081_s4 + $0x30] sm:$0xff]  ;;  %vm384_vm1 = vcmask 1048064   ;;  %vm417_vm2 = vcmask 523264  }
  0x16   : > { %354 = vmatpush.bf16.msra.mxu0 %v696_v3  ;;  %379 = vperm.xlu0 %779, %v376_v5   ;;  %s680_s13 = sshll.u32 %s302_s12, 2  ;;  %v414_v12 = vld [vmem:[%s1081_s4 + $0x28] sm:$0xff]  ;;  %v315_v13 = vperm.slane %v974_v9, 0  ;;  %v413_v14 = vld [vmem:[%s1081_s4 + $0x20] sm:$0xff]  ;;  %v412_v17 = vld [vmem:[%s1081_s4 + $0x18] sm:$0xff]  ;;  %vm447_vm3 = vcmask 15360  }
  0x17   : > { %s304_s9 = scalar_lea.vmem %s1077_s0, %s680_s13  ;;  %432 = vmatpush.msra.mxu2 %v416_v10  ;;  %v411_v19 = vld [vmem:[%s1081_s4 + $0x10] sm:$0xff]  ;;  %v410_v21 = vld [vmem:[%s1081_s4 + $0x8] sm:$0xff]  ;;  %v409_v39 = vld [vmem:[%s1081_s4] sm:$0xff]  ;;  %vm493_vm4 = vcmask 1041408   ;;  %vm554_vm5 = vcmask 1041409   ;;  %vm597_vm6 = vcmask 254976  }
  0x18   : > { %v967_v8 = vld [vmem:[%s304_s9] sm:$0xff]  ;;  %v732_v46 = vld [vmem:[%s1078_s1 + $0x14] sm:$0xf]  ;;  %v697_v47 = vld [vmem:[%s1078_s1 + $0x18] sm:$0xf0]  ;;  %s678_s9 = sshll.u32 %s297_s18, 1 }
  0x19   : > { %433 = vmatpush.msra.mxu2 %v415_v11  ;;  %v700_v49 = vor.u32 %v732_v46, %v697_v47  ;;  %v730_v51 = vld [vmem:[%s1078_s1 + $0x4] sm:$0xf]  ;;  %v689_v52 = vld [vmem:[%s1078_s1 + $0x8] sm:$0xf0]  ;;  %v486_v57 = vld [vmem:[%s1082_s5] sm:$0x3] }
  0x1a   : > { %355 = vmatpush.bf16.msra.mxu0 %v688_v7  ;;  %v692_v54 = vor.u32 %v730_v51, %v689_v52  ;;  %705 = vmatpush.msk.msra.mxu3 %vm493_vm4, %v486_v57  ;;  %s299_s24 = scalar_lea.vmem [#allocation2], %s678_s9  ;;  %s600_s12 = scalar_lea.sflag [#allocation3], %s297_s18 }
  0x1b   : > { %434 = vmatpush.msra.mxu2 %v414_v12  ;;  %368 = vmatpush.bf16.msra.mxu1 %v700_v49  ;;  %s612_s26 = sshll.u32 %s299_s24, 4  ;;  %s803_s13 = sshra.s32 %s615_s10, 4  ;;  %s613_s26 = int_to_ptr.vmem [resolvable:$true] %s612_s26  ;;  %s804_s13 = int_to_ptr.hbm [resolvable:$true] %s803_s13 }
  0x1c   : > { %s805_s17 = scalar_lea.hbm %s804_s13, 2  ;;  %s809_s9 = scalar_lea.hbm %s1085_s8, 4 }
  0x1d   : > { %701 = vmatmul.msk.bf16.vlgmr.msra.gmra.mxu0 %vm344_vm0, %v967_v8  ;;  %435 = vmatpush.msra.mxu2 %v413_v14  ;;  %p806_p11 = scmp.ne.s32.totalorder %s804_s13, %s805_s17  ;;  %p810_p0 = scmp.lt.s32.totalorder %s804_s13, %s1085_s8 }
  0x1e   : > { %p811_p1 = scmp.lt.s32.totalorder %s809_s9, %s805_s17 }
  0x1f   : > { %436 = vmatpush.msra.mxu2 %v412_v17  ;;  %369 = vmatpush.bf16.msra.mxu1 %v692_v54  ;;  %p807_p12 = pnand %p806_p11, %p935_p5 }
  0x20   : > { %p812_p2 = por %p811_p1, %p810_p0 }
  0x21   : > { %437 = vmatpush.msra.mxu2 %v411_v19  ;;  %p808_p13 = pneg %p807_p12 }
  0x22   : > { %702 = vmatmul.msk.bf16.vlgmr.msra.gmra.mxu1 %vm344_vm0, %v967_v8 }
  0x23   : > { %438 = vmatpush.msra.mxu2 %v410_v21  ;;  %p813_p3 = pnand %p812_p2, %p808_p13 }
  0x25   : > { %439 = vmatpush.msra.mxu2 %v409_v39 }
  0x88   : > { %v380_v16 = vpop.permute.xlu0 %379 }
  0x9a   : > { %v357_v15 = vpop.f32.mrf.mxu0 }
  0x9b   : > { %v358_v18 = vadd.f32 %v357_v15, %v315_v13 }
  0x9d   : > { %v382_v20 = vmul.f32 %v380_v16, %v358_v18 }
  0x9f   : > { %v385_v22 = vsel %vm384_vm1, %v382_v20, 0.0 }
  0xa0   : > { %v386_v23 = vrot.slane %v385_v22, 4 }
  0xa2   : > { %v387_v24 = vadd.f32 %v386_v23, %v385_v22  ;;  %v359_v25 = vpop.f32.mrf.mxu0 }
  0xa3   : > { %v360_v26 = vadd.f32 %v359_v25, %v315_v13 }
  0xa4   : > { %v388_v27 = vrot.slane %v387_v24, 2 }
  0xa5   : > { %v383_v28 = vmul.f32 %v380_v16, %v360_v26 }
  0xa6   : > { %v389_v29 = vadd.f32 %v388_v27, %v387_v24 }
  0xa7   : > { %v392_v30 = vsel %vm384_vm1, %v383_v28, 0.0  ;;  %v737_v28 = vld [vmem:[%s1083_s6 + $0x18] sm:$0xff] }
  0xa8   : > { %v393_v31 = vrot.slane %v392_v30, 4  ;;  %v390_v32 = vrot.slane %v389_v29, 1  ;;  %588 = vmatpush.bf16.msrb.mxu3 %v737_v28 }
  0xaa   : > { %v391_v33 = vadd.f32 %v390_v32, %v389_v29  ;;  %v394_v34 = vadd.f32 %v393_v31, %v392_v30  ;;  %v736_v29 = vld [vmem:[%s1083_s6 + $0x10] sm:$0xff]  ;;  %v735_v30 = vld [vmem:[%s1083_s6 + $0x8] sm:$0xff]  ;;  %v316_v31 = vperm.slane %v974_v9, 1  ;;  %v371_v32 = vpop.f32.mrf.mxu1 }
  0xac   : > { %401 = vrot.lane.b32.xlu0 %v391_v33, %s854_s22  ;;  %v395_v35 = vrot.slane %v394_v34, 2  ;;  %589 = vmatpush.bf16.msrb.mxu3 %v736_v29  ;;  %v734_v33 = vld [vmem:[%s1083_s6] sm:$0xff] }
  0xae   : > { %v396_v36 = vadd.f32 %v395_v35, %v394_v34  ;;  %v372_v34 = vadd.f32 %v371_v32, %v316_v31 }
  0xb0   : > { %v397_v37 = vrot.slane %v396_v36, 1  ;;  %590 = vmatpush.bf16.msrb.mxu3 %v735_v30 }
  0xb2   : > { %v398_v38 = vadd.f32 %v397_v37, %v396_v36 }
  0xb4   : > { %403 = vrot.lane.b32.xlu1 %v398_v38, %s854_s22  ;;  %591 = vmatpush.bf16.msrb.mxu3 %v734_v33  ;;  %v373_v38 = vpop.f32.mrf.mxu1 }
 0x11e   : > { %v402_v40 = vpop.permute.xlu0 %401 }
 0x11f   : > { %v407_v41 = vmul.f32 %v402_v40, %v358_v18 }
 0x121   : > { %703 = vmatmul.msk.f32.vlgmr.msra.gmra.mxu2 %vm417_vm2, %v407_v41  ;;  %v374_v41 = vadd.f32 %v373_v38, %v316_v31 }
 0x126   : > { %v404_v42 = vpop.permute.xlu1 %403 }
 0x127   : > { %v408_v43 = vmul.f32 %v404_v42, %v360_v26 }
 0x129   : > { %704 = vmatmul.msk.f32.gmra.mxu2 %vm417_vm2, %v408_v43 }
 0x1a4   : > { %v441_v44 = vpop.f32.mrf.mxu2 }
 0x1a5   : > { %v448_v45 = vsel %vm447_vm3, %v441_v44, -inf }
 0x1a6   : > { %v449_v48 = vrot.slane %v448_v45, 4 }
 0x1a8   : > { %v450_v50 = vmax.f32 %v448_v45, %v449_v48 }
 0x1aa   : > { %v451_v53 = vrot.slane %v450_v50, 2 }
 0x1ac   : > { %v452_v55 = vmax.f32 %v450_v50, %v451_v53  ;;  %v444_v56 = vpop.f32.mrf.mxu2 }
 0x1ad   : > { %v455_v58 = vsel %vm447_vm3, %v444_v56, -inf }
 0x1ae   : > { %v453_v59 = vrot.slane %v452_v55, 1  ;;  %v456_v60 = vrot.slane %v455_v58, 4 }
 0x1b0   : > { %v454_v61 = vmax.f32 %v452_v55, %v453_v59  ;;  %v457_v62 = vmax.f32 %v455_v58, %v456_v60  ;;  %v780_v60 = vld [vmem:[%s1084_s7] ss:$0 sm:$0xff] }
 0x1b2   : > { %v462_v63 = vsub.f32 %v441_v44, %v454_v61  ;;  %v458_v0 = vrot.slane %v457_v62, 2 }
 0x1b4   : > { %v464_v1 = vmul.f32 1.442695, %v462_v63  ;;  %v459_v2 = vmax.f32 %v457_v62, %v458_v0 }
 0x1b6   : > { %781 = vpow2.f32 %v464_v1  ;;  %v460_v3 = vrot.slane %v459_v2, 1 }
 0x1b8   : > { %v461_v4 = vmax.f32 %v459_v2, %v460_v3 }
 0x1ba   : > { %v463_v5 = vsub.f32 %v444_v56, %v461_v4 }
 0x1bc   : > { %v782_v6 = vpop.eup %781  ;;  %v466_v7 = vmul.f32 1.442695, %v463_v5 }
 0x1bd   : > { %v468_v10 = vsel %vm447_vm3, %v782_v6, 0.0 }
 0x1be   : > { %v469_v11 = vrot.slane %v468_v10, 4  ;;  %783 = vpow2.f32 %v466_v7 }
 0x1c0   : > { %v470_v12 = vadd.f32 %v469_v11, %v468_v10 }
 0x1c2   : > { %v471_v13 = vrot.slane %v470_v12, 2 }
 0x1c4   : > { %v784_v14 = vpop.eup %783  ;;  %v472_v8 = vadd.f32 %v471_v13, %v470_v12 }
 0x1c5   : > { %v475_v15 = vsel %vm447_vm3, %v784_v14, 0.0 }
 0x1c6   : > { %v476_v16 = vrot.slane %v475_v15, 4  ;;  %v473_v17 = vrot.slane %v472_v8, 1 }
 0x1c8   : > { %v477_v18 = vadd.f32 %v476_v16, %v475_v15  ;;  %v474_v19 = vadd.f32 %v473_v17, %v472_v8 }
 0x1ca   : > { %v478_v20 = vrot.slane %v477_v18, 2  ;;  %785 = vrcp.f32 %v474_v19 }
 0x1cc   : > { %v479_v21 = vadd.f32 %v478_v20, %v477_v18 }
 0x1ce   : > { %v480_v22 = vrot.slane %v479_v21, 1 }
 0x1d0   : > { %v786_v23 = vpop.eup %785  ;;  %v481_v24 = vadd.f32 %v480_v22, %v479_v21 }
 0x1d1   : > { %v484_v25 = vmul.f32 %v786_v23, %v782_v6 }
 0x1d2   : > { %787 = vrcp.f32 %v481_v24 }
 0x1d3   : > { %706 = vmatmul.msk.f32.vlgmr.msra.gmra.mxu3 %vm447_vm3, %v484_v25 }
 0x1d8   : > { %v788_v26 = vpop.eup %787 }
 0x1d9   : > { %v485_v27 = vmul.f32 %v788_v26, %v784_v14 }
 0x1db   : > { %707 = vmatmul.msk.f32.gmra.mxu3 %vm447_vm3, %v485_v27 }
 0x256   : > { %v514_v35 = vpop.f32.mrf.mxu3 }
 0x257   : > { %v520_v36 = vmul.f32 %v514_v35, %v372_v34 }
 0x259   : > { %v522_v37 = vsel %vm417_vm2, %v520_v36, 0.0 }
 0x25a   : > { %v523_v39 = vrot.slane %v522_v37, 4 }
 0x25c   : > { %v524_v40 = vadd.f32 %v523_v39, %v522_v37 }
 0x25e   : > { %v525_v42 = vrot.slane %v524_v40, 2  ;;  %v517_v43 = vpop.f32.mrf.mxu3 }
 0x25f   : > { %v521_v44 = vmul.f32 %v517_v43, %v374_v41 }
 0x260   : > { %v526_v45 = vadd.f32 %v525_v42, %v524_v40 }
 0x261   : > { %v529_v9 = vsel %vm417_vm2, %v521_v44, 0.0 }
 0x262   : > { %v530_v46 = vrot.slane %v529_v9, 4  ;;  %v527_v47 = vrot.slane %v526_v45, 1 }
 0x264   : > { %v531_v48 = vadd.f32 %v530_v46, %v529_v9  ;;  %v528_v50 = vadd.f32 %v527_v47, %v526_v45 }
 0x266   : > { %v532_v49 = vrot.slane %v531_v48, 2  ;;  %v536_v53 = vpack.c.bf16 %v528_v50, %v528_v50 }
 0x268   : > { %v533_v51 = vadd.f32 %v532_v49, %v531_v48  ;;  %v552_v56 = vunpack.c.l.b16 %v536_v53 }
 0x26a   : > { %v534_v52 = vrot.slane %v533_v51, 1 }
 0x26c   : > { %v535_v54 = vadd.f32 %v534_v52, %v533_v51 }
 0x26e   : > { %v537_v55 = vpack.c.bf16 %v535_v54, %v535_v54 }
 0x270   : > { %v553_v57 = vunpack.c.l.b16 %v537_v55 }
 0x272   : > { %v555_v58 = vsel %vm554_vm5, %v553_v57, %v552_v56 }
 0x273   : > { %v556_v59 = vpack.c.b16 %v555_v58, %v555_v58 }
 0x275   : > { %724 = vmatmul.msk.bf16.vlgmr.msrb.gmra.mxu3 %vm417_vm2, %v556_v59 }
 0x2f8   : > { %v593_v61 = vpop.f32.mrf.mxu3 }
 0x2f9   : > { %v594_v62 = vadd.f32 %v780_v60, %v593_v61 }
 0x2fb   : > { %598 = vst.msk [vmem:[%s299_s24] sm:$0x3] %vm597_vm6, %v594_v62 }
 0x2fc   : > { %816 = shalt.err (!%p813_p3)
}
 0x2fd   : > { %738 = dma.vmem_to_hbm [thread:$0]  (%p935_p5), %s613_s26, 32, %s615_s10, %s600_s12  }
 0x300   : > { %v595_v63 = vpop.f32.mrf.mxu3 }
 0x301 PF: > { %p744_p4 = scmp.ge.s32.totalorder %s851_s30, 2  ;;  %s626_s18 = sand.u32 1, %s839_s27  }
 0x302   : > { %s627_s22 = scalar_lea.sflag [#allocation3], %s626_s18 }
 0x303   : > { %p741_p7 = pnand %p744_p4, %p939_p6 }
 0x305   : > { %p742_p8 = pneg %p741_p7 }
 0x307   : > { %834 = dma.done.wait (%p742_p8), %s627_s22, 32  }
 0x308   : > { %836 = vsyncadd (%p742_p8), %s627_s22, 4294967264  ;;  %p18_p9 = scmp.ge.s32.totalorder %s923_s11, 4   ;;  %s1088_s27 = smov %s843_s28 }
 0x309   : > { %s1089_s28 = smov %s847_s29  ;;  %s1090_s29 = smov %s933_s14 }
 0x30a   : > { %s1091_s30 = smov %s923_s11  ;;  %20 = sbr.rel (!%p18_p9) target bundleno = 3 (0x3), region = 87 }
 0x30f   :  { %633 = vsyncpa [#allocation3], 1 }
 0x310   :  { %635 = vsyncpa [#allocation3 + $0x1], 1 }

</bundles_post_ra>
